<compile_context>
chip_gen: v6e
topology: v6e:2x2x1
jax: 0.10.0
libtpu: 0.0.40
codegen_flags: <defaults>
</compile_context>

<pallas_src>
import functools

import jax
import jax.numpy as jnp
from jax.experimental import pallas as pl
from jax.experimental.pallas import tpu as pltpu

NC_PAD = 128   # encoder output channels padded to one full 128-lane tile
K_PAD = 128    # im2col contraction (9 * ch) padded to one full 128-lane tile


# ----------------------------------------------------------------------------
# Fused kernel: conv(3x3,s2,p1)+bias+ReLU  ->  [max||avg] pool  ->  FC-ReLU-FC
# One grid step == one batch sample; all activations stay in VMEM.
# ----------------------------------------------------------------------------
def fused_forward_kernel(xc_ref, wcol_ref, bconv_ref, w1_ref, b1_ref,
                         w2_ref, b2_ref, o_ref, *, inv_rows):
    # Encoder conv as a single lane-dense matmul over the im2col patch matrix.
    y = jnp.dot(xc_ref[0], wcol_ref[...], preferred_element_type=jnp.float32)
    y = jnp.maximum(y + bconv_ref[...], 0.0)                # (rows, NC_PAD)

    # AdaptiveConcatPool2d over all n*ho*wo positions of this sample.
    mx = jnp.max(y, axis=0, keepdims=True)                  # (1, NC_PAD)
    av = jnp.sum(y, axis=0, keepdims=True) * inv_rows       # (1, NC_PAD)
    feat = jnp.concatenate([mx, av], axis=-1)               # (1, 2*NC_PAD) [max||avg]

    # Head: Linear -> ReLU -> Linear (tiny matvecs, latency-bound).
    h = jnp.dot(feat, w1_ref[...], preferred_element_type=jnp.float32) + b1_ref[...]
    h = jnp.maximum(h, 0.0)
    o_ref[0] = jnp.dot(h, w2_ref[...], preferred_element_type=jnp.float32) + b2_ref[...]


def multi_instance_forward(x, params):
    bs, n, ch, w, h = x.shape
    assert w % 2 == 0 and h % 2 == 0, "toy stand-in assumes even spatial dims"
    ho = (w - 1) // 2 + 1            # conv output spatial (stride 2, pad 1, k=3)
    wo = (h - 1) // 2 + 1
    rows = n * ho * wo
    k = 9 * ch
    assert k <= K_PAD

    # im2col in the wrapper (layout plumbing only, no compute): NCHW -> NHWC,
    # zero-pad spatially, gather the 9 stride-2 conv taps, lane-pad to 128.
    x_nhwc = jnp.transpose(x, (0, 1, 3, 4, 2))                       # (bs,n,W,H,ch)
    x_pad = jnp.pad(x_nhwc, ((0, 0), (0, 0), (1, 1), (1, 1), (0, 0)))
    taps = [x_pad[:, :, i:i + 2 * ho:2, j:j + 2 * wo:2, :]           # (bs,n,ho,wo,ch)
            for i in range(3) for j in range(3)]
    x_col = jnp.concatenate(taps, axis=-1).reshape(bs, rows, k)      # (bs,rows,9*ch)
    x_col = jnp.pad(x_col, ((0, 0), (0, 0), (0, K_PAD - k)))         # (bs,rows,128)

    w_col, b_conv = params["w_col"], params["b_conv"]
    w1, b1, w2, b2 = params["w1_pad"], params["b1"], params["w2"], params["b2"]
    feat_dim = w1.shape[-1]
    num_classes = w2.shape[-1]

    kern = functools.partial(fused_forward_kernel, inv_rows=1.0 / rows)
    out = pl.pallas_call(
        kern,
        out_shape=jax.ShapeDtypeStruct((bs, 1, num_classes), jnp.float32),
        grid_spec=pltpu.PrefetchScalarGridSpec(
            num_scalar_prefetch=0,
            grid=(bs,),                       # 1 sample / step; megacore split on v7x
            in_specs=[
                pl.BlockSpec((1, rows, K_PAD), lambda b: (b, 0, 0)),
                pl.BlockSpec((K_PAD, NC_PAD), lambda b: (0, 0)),
                pl.BlockSpec((1, NC_PAD), lambda b: (0, 0)),
                pl.BlockSpec((2 * NC_PAD, feat_dim), lambda b: (0, 0)),
                pl.BlockSpec((1, feat_dim), lambda b: (0, 0)),
                pl.BlockSpec((feat_dim, num_classes), lambda b: (0, 0)),
                pl.BlockSpec((1, num_classes), lambda b: (0, 0)),
            ],
            out_specs=pl.BlockSpec((1, 1, num_classes), lambda b: (b, 0, 0)),
        ),
        compiler_params=pltpu.CompilerParams(dimension_semantics=("parallel",)),
    )(x_col, w_col, b_conv, w1, b1, w2, b2)
    return out.reshape(bs, num_classes)


# ----------------------------------------------------------------------------
# Parameters: PyTorch-layout weights + kernel-side (lane-padded) packing
# ----------------------------------------------------------------------------
def make_params(ch, nc, feat_dim, num_classes, key):
    assert nc <= NC_PAD and 9 * ch <= K_PAD
    ks = jax.random.split(key, 6)
    conv_w = 0.1 * jax.random.normal(ks[0], (nc, ch, 3, 3), jnp.float32)  # (Cout,Cin,kh,kw)
    conv_b = 0.1 * jax.random.normal(ks[1], (nc,), jnp.float32)
    w1 = 0.05 * jax.random.normal(ks[2], (2 * nc, feat_dim), jnp.float32)  # Linear(2*nc, D)
    b1 = 0.05 * jax.random.normal(ks[3], (feat_dim,), jnp.float32)
    w2 = 0.05 * jax.random.normal(ks[4], (feat_dim, num_classes), jnp.float32)
    b2 = 0.05 * jax.random.normal(ks[5], (num_classes,), jnp.float32)

    # Conv weight in im2col layout: rows ordered (i, j, c) to match the tap
    # concatenation order in the wrapper; zero-padded to (K_PAD, NC_PAD).
    w_col = jnp.transpose(conv_w, (2, 3, 1, 0)).reshape(9 * ch, nc)
    w_col = jnp.pad(w_col, ((0, K_PAD - 9 * ch), (0, NC_PAD - nc)))
    b_conv = jnp.pad(conv_b, (0, NC_PAD - nc)).reshape(1, NC_PAD)
    # w1 rows re-indexed to the padded [max(0:128) || avg(128:256)] ordering;
    # padded channels carry zero weights so they contribute nothing.
    w1_pad = jnp.zeros((2 * NC_PAD, feat_dim), jnp.float32)
    w1_pad = w1_pad.at[:nc].set(w1[:nc]).at[NC_PAD:NC_PAD + nc].set(w1[nc:])

    raw = dict(conv_w=conv_w, conv_b=conv_b, w1=w1, b1=b1, w2=w2, b2=b2)
    packed = dict(w_col=w_col, b_conv=b_conv, w1_pad=w1_pad,
                  b1=b1.reshape(1, feat_dim), w2=w2,
                  b2=b2.reshape(1, num_classes))
    return raw, packed


# ----------------------------------------------------------------------------
# Pure-JAX reference of the module forward (for correctness validation)
# ----------------------------------------------------------------------------
def reference_forward(x, raw):
    bs, n, ch, w, h = x.shape
    xi = x.reshape(bs * n, ch, w, h)
    y = jax.lax.conv_general_dilated(
        xi, raw["conv_w"], window_strides=(2, 2), padding=((1, 1), (1, 1)),
        dimension_numbers=("NCHW", "OIHW", "NCHW"))
    y = jnp.maximum(y + raw["conv_b"].reshape(1, -1, 1, 1), 0.0)
    _, ch2, w2, h2 = y.shape
    y = y.reshape(bs, n, ch2, w2, h2).transpose(0, 2, 1, 3, 4)
    y = y.reshape(bs, ch2, n * w2, h2)
    mx = jnp.max(y, axis=(2, 3))
    av = jnp.mean(y, axis=(2, 3))
    feat = jnp.concatenate([mx, av], axis=1)            # AdaptiveConcatPool2d + Flatten
    hdd = jnp.maximum(feat @ raw["w1"] + raw["b1"], 0.0)
    return hdd @ raw["w2"] + raw["b2"]


if __name__ == "__main__":
    # Small shapes consistent with the module's forward (bs, n_instance, ch, w, h)
    bs, n, ch, w, h = 2, 5, 4, 16, 16
    nc = 32                   # encoder output channels (stand-in for SE-ResNeXt nc)
    feat_dim = 128            # center_loss_feat_dim (scaled down from 512)
    num_classes = 1

    key = jax.random.PRNGKey(0)
    kx, kp = jax.random.split(key)
    x = jax.random.normal(kx, (bs, n, ch, w, h), jnp.float32)
    raw, packed = make_params(ch, nc, feat_dim, num_classes, kp)

    out = multi_instance_forward(x, packed)
    out = jax.block_until_ready(out)
    assert out.shape == (bs, num_classes), out.shape

    ref = jax.block_until_ready(reference_forward(x, raw))
    max_err = float(jnp.max(jnp.abs(out - ref)))
    assert max_err < 5e-2, f"mismatch vs reference: max abs err {max_err}"
    print("KERNEL_OK")
</pallas_src>

<mosaic_0001>
module attributes {stable_mosaic.version = 11 : i64} {
  func.func @fused_forward_kernel(%arg0: i32, %arg1: memref<1x320x128xf32, #tpu.memory_space<vmem>>, %arg2: memref<128x128xf32, #tpu.memory_space<vmem>>, %arg3: memref<1x128xf32, #tpu.memory_space<vmem>>, %arg4: memref<256x128xf32, #tpu.memory_space<vmem>>, %arg5: memref<1x128xf32, #tpu.memory_space<vmem>>, %arg6: memref<128x1xf32, #tpu.memory_space<vmem>>, %arg7: memref<1x1xf32, #tpu.memory_space<vmem>>, %arg8: memref<1x1x1xf32, #tpu.memory_space<vmem>>) attributes {dimension_semantics = [#tpu.dimension_semantics<parallel>], iteration_bounds = array<i64: 2>, scalar_prefetch = 0 : i64, scratch_operands = 0 : i64, tpu.core_type = #tpu.core_type<tc>, window_params = [{transform_indices = @transform_0, window_bounds = array<i64: 1, 320, 128>}, {pipeline_mode = #tpu.pipeline_mode<synchronous>, transform_indices = @transform_1, window_bounds = array<i64: 128, 128>}, {pipeline_mode = #tpu.pipeline_mode<synchronous>, transform_indices = @transform_2, window_bounds = array<i64: 1, 128>}, {pipeline_mode = #tpu.pipeline_mode<synchronous>, transform_indices = @transform_3, window_bounds = array<i64: 256, 128>}, {pipeline_mode = #tpu.pipeline_mode<synchronous>, transform_indices = @transform_4, window_bounds = array<i64: 1, 128>}, {pipeline_mode = #tpu.pipeline_mode<synchronous>, transform_indices = @transform_5, window_bounds = array<i64: 128, 1>}, {pipeline_mode = #tpu.pipeline_mode<synchronous>, transform_indices = @transform_6, window_bounds = array<i64: 1, 1>}, {transform_indices = @transform_7, window_bounds = array<i64: 1, 1, 1>}]} {
    %c0 = arith.constant 0 : index
    %c0_0 = arith.constant 0 : index
    %c0_1 = arith.constant 0 : index
    %0 = vector.load %arg1[%c0, %c0_0, %c0_1] : memref<1x320x128xf32, #tpu.memory_space<vmem>>, vector<1x320x128xf32>
    %1 = vector.shape_cast %0 : vector<1x320x128xf32> to vector<320x128xf32>
    %c0_2 = arith.constant 0 : index
    %c0_3 = arith.constant 0 : index
    %2 = vector.load %arg2[%c0_2, %c0_3] : memref<128x128xf32, #tpu.memory_space<vmem>>, vector<128x128xf32>
    %cst = arith.constant dense<0.000000e+00> : vector<320x128xf32>
    %3 = tpu.matmul %1, %2, %cst {dimension_numbers = #tpu.dot_dimension_numbers<[1], [0], [0], [1], [0, 0, 1, 1], [], []>} : vector<320x128xf32>, vector<128x128xf32>, vector<320x128xf32> -> vector<320x128xf32>
    %c0_4 = arith.constant 0 : index
    %c0_5 = arith.constant 0 : index
    %4 = vector.load %arg3[%c0_4, %c0_5] : memref<1x128xf32, #tpu.memory_space<vmem>>, vector<1x128xf32>
    %5 = vector.broadcast %4 : vector<1x128xf32> to vector<320x128xf32>
    %6 = arith.addf %3, %5 : vector<320x128xf32>
    %cst_6 = arith.constant 0.000000e+00 : f32
    %7 = vector.broadcast %cst_6 : f32 to vector<320x128xf32>
    %8 = arith.maximumf %6, %7 : vector<320x128xf32>
    %cst_7 = arith.constant dense<0xFF800000> : vector<128xf32>
    %9 = vector.multi_reduction <maximumf>, %8, %cst_7 [0] : vector<320x128xf32> to vector<128xf32>
    %10 = vector.shape_cast %9 : vector<128xf32> to vector<1x128xf32>
    %cst_8 = arith.constant dense<0.000000e+00> : vector<128xf32>
    %11 = vector.multi_reduction <add>, %8, %cst_8 [0] : vector<320x128xf32> to vector<128xf32>
    %12 = vector.shape_cast %11 : vector<128xf32> to vector<1x128xf32>
    %cst_9 = arith.constant 3.125000e-03 : f32
    %13 = vector.broadcast %cst_9 : f32 to vector<1x128xf32>
    %14 = arith.mulf %12, %13 : vector<1x128xf32>
    %15 = tpu.concatenate %10, %14 in 1 : vector<1x128xf32>, vector<1x128xf32> -> vector<1x256xf32>
    %c0_10 = arith.constant 0 : index
    %c0_11 = arith.constant 0 : index
    %16 = vector.load %arg4[%c0_10, %c0_11] : memref<256x128xf32, #tpu.memory_space<vmem>>, vector<256x128xf32>
    %cst_12 = arith.constant dense<0.000000e+00> : vector<1x128xf32>
    %17 = tpu.matmul %15, %16, %cst_12 {dimension_numbers = #tpu.dot_dimension_numbers<[1], [0], [0], [1], [0, 0, 1, 1], [], []>} : vector<1x256xf32>, vector<256x128xf32>, vector<1x128xf32> -> vector<1x128xf32>
    %c0_13 = arith.constant 0 : index
    %c0_14 = arith.constant 0 : index
    %18 = vector.load %arg5[%c0_13, %c0_14] : memref<1x128xf32, #tpu.memory_space<vmem>>, vector<1x128xf32>
    %19 = arith.addf %17, %18 : vector<1x128xf32>
    %cst_15 = arith.constant 0.000000e+00 : f32
    %20 = vector.broadcast %cst_15 : f32 to vector<1x128xf32>
    %21 = arith.maximumf %19, %20 : vector<1x128xf32>
    %c0_16 = arith.constant 0 : index
    %c0_17 = arith.constant 0 : index
    %22 = vector.load %arg6[%c0_16, %c0_17] : memref<128x1xf32, #tpu.memory_space<vmem>>, vector<128x1xf32>
    %cst_18 = arith.constant dense<0.000000e+00> : vector<1x1xf32>
    %23 = tpu.matmul %21, %22, %cst_18 {dimension_numbers = #tpu.dot_dimension_numbers<[1], [0], [0], [1], [0, 0, 1, 1], [], []>} : vector<1x128xf32>, vector<128x1xf32>, vector<1x1xf32> -> vector<1x1xf32>
    %c0_19 = arith.constant 0 : index
    %c0_20 = arith.constant 0 : index
    %24 = vector.load %arg7[%c0_19, %c0_20] : memref<1x1xf32, #tpu.memory_space<vmem>>, vector<1x1xf32>
    %25 = arith.addf %23, %24 : vector<1x1xf32>
    %c0_21 = arith.constant 0 : index
    %c0_22 = arith.constant 0 : index
    %c0_23 = arith.constant 0 : index
    %26 = vector.load %arg8[%c0_21, %c0_22, %c0_23] : memref<1x1x1xf32, #tpu.memory_space<vmem>>, vector<1x1x1xf32>
    %27 = vector.shape_cast %26 : vector<1x1x1xf32> to vector<1x1xf32>
    %28 = vector.shape_cast %25 : vector<1x1xf32> to vector<1x1x1xf32>
    tpu.vector_store %arg8[%c0_21, %c0_22, %c0_23], %28 {strides = array<i32>} : memref<1x1x1xf32, #tpu.memory_space<vmem>>, vector<1x1x1xf32>,
    return
  }
  func.func @transform_0(%arg0: i32) -> (i32, i32, i32) {
    %c0_i32 = arith.constant 0 : i32
    %c0_i32_0 = arith.constant 0 : i32
    %c0_i32_1 = arith.constant 0 : i32
    return %arg0, %c0_i32, %c0_i32_0 : i32, i32, i32
  }
  func.func @transform_1(%arg0: i32) -> (i32, i32) {
    %c0_i32 = arith.constant 0 : i32
    %c0_i32_0 = arith.constant 0 : i32
    %c0_i32_1 = arith.constant 0 : i32
    return %c0_i32, %c0_i32_0 : i32, i32
  }
  func.func @transform_2(%arg0: i32) -> (i32, i32) {
    %c0_i32 = arith.constant 0 : i32
    %c0_i32_0 = arith.constant 0 : i32
    %c0_i32_1 = arith.constant 0 : i32
    return %c0_i32, %c0_i32_0 : i32, i32
  }
  func.func @transform_3(%arg0: i32) -> (i32, i32) {
    %c0_i32 = arith.constant 0 : i32
    %c0_i32_0 = arith.constant 0 : i32
    %c0_i32_1 = arith.constant 0 : i32
    return %c0_i32, %c0_i32_0 : i32, i32
  }
  func.func @transform_4(%arg0: i32) -> (i32, i32) {
    %c0_i32 = arith.constant 0 : i32
    %c0_i32_0 = arith.constant 0 : i32
    %c0_i32_1 = arith.constant 0 : i32
    return %c0_i32, %c0_i32_0 : i32, i32
  }
  func.func @transform_5(%arg0: i32) -> (i32, i32) {
    %c0_i32 = arith.constant 0 : i32
    %c0_i32_0 = arith.constant 0 : i32
    %c0_i32_1 = arith.constant 0 : i32
    return %c0_i32, %c0_i32_0 : i32, i32
  }
  func.func @transform_6(%arg0: i32) -> (i32, i32) {
    %c0_i32 = arith.constant 0 : i32
    %c0_i32_0 = arith.constant 0 : i32
    %c0_i32_1 = arith.constant 0 : i32
    return %c0_i32, %c0_i32_0 : i32, i32
  }
  func.func @transform_7(%arg0: i32) -> (i32, i32, i32) {
    %c0_i32 = arith.constant 0 : i32
    %c0_i32_0 = arith.constant 0 : i32
    %c0_i32_1 = arith.constant 0 : i32
    return %arg0, %c0_i32, %c0_i32_0 : i32, i32, i32
  }
}

</mosaic_0001>

<bundles_post_ra>
// kernel: tpu_custom_call.1
= control target key start
LH: loop header
LB: loop body
LE: loop exit
PB: predicated region body
PF: predicated region fallthrough
CT: control target
= control target key end

     0   :  { %s2000_s0 = inlined_call_operand.hbm [shape: f32[2,320,128], index: 0, kind: input, shape index: {}]   ;;  %s2001_s1 = inlined_call_operand.vmem [shape: f32[128,128], index: 1, kind: input, shape index: {}]   ;;  %s2002_s2 = inlined_call_operand.vmem [shape: f32[1,128], index: 2, kind: input, shape index: {}]   ;;  %s2003_s3 = inlined_call_operand.hbm [shape: f32[256,128], index: 3, kind: input, shape index: {}]   ;;  %s2004_s4 = inlined_call_operand.vmem [shape: f32[1,128], index: 4, kind: input, shape index: {}]   ;;  %s2005_s5 = inlined_call_operand.vmem [shape: f32[128,1], index: 5, kind: input, shape index: {}]   ;;  %s2006_s6 = inlined_call_operand.<no memory space> [shape: f32[1,1], index: 6, kind: input, shape index: {}]   ;;  %s2007_s7 = inlined_call_operand.vmem [shape: f32[2,1,1], index: 7, kind: output, shape index: {}]  }
   0x1   :  { %v12_v0 = vstv %s2006_s6 }
   0x2   :  { %13 = vst [vmem:[#allocation2] sm:$0x1] %v12_v0 }
   0x3   :  { %14 = vsyncpa [#allocation4], 0 }
   0x4   :  { %16 = vsyncpa [#allocation4 + $0x1], 0 }
   0x5   :  { %17 = vsyncpa [#allocation6], 0  ;;  %s1478_s26 = smov 0   ;;  %s1480_s27 = smov 0  }
   0x6   :  { %s1482_s28 = smov 0   ;;  %s1484_s29 = smov 0  }
   0x7 LB: > { %s1497_s6 = sadd.s32 4294967295, %s1427_s29   ;;  %p43_p0 = scmp.ne.s32.totalorder %s1419_s27, %s1415_s26  ;;  %s1427_s29 = sphi %s1484_s29, %s2037_s29   ;;  %s1423_s28 = sphi %s1482_s28, %s2036_s28   ;;  %s1419_s27 = sphi %s1480_s27, %s2035_s27   ;;  %s1415_s26 = sphi %s1478_s26, %s2034_s26  }
   0x8   : > { %p2008_p1 = scmp.eq.s32.totalorder %s1497_s6, 0  ;;  %p1034_p2 = scmp.ge.s32.totalorder %s1427_s29, 1 }
   0x9   : > { %p206_p3 = scmp.lt.s32.totalorder %s1427_s29, 3  ;;  %s1429_s9 = smov [#allocation5]  }
   0xa   : > { %p1505_p4 = por %p2008_p1, %p43_p0  ;;  %s224_s10 = sshll.u32 %s1429_s9, 4  ;;  %s225_s10 = int_to_ptr.vmem [resolvable:$true] %s224_s10 }
   0xb   : > { %p1509_p5 = pnand %p1034_p2, %p206_p3  ;;  %s1522_s12 = sadd.s32 1, %s1427_s29  }
   0xc   : > { %s2019_s30 = scalar_select %p1505_p4, 1, 0 }
   0xd   : > { %s2020_s8 = scalar_select %p1509_p5, 1, 0 }
   0xe   : > { %p1287_p6 = pneg %p1509_p5  ;;  %s30_s13 = sadd.s32 1, %s1423_s28 }
   0xf   : > { %s27_s14 = ssub.s32 %s1427_s29, %s1522_s12  ;;  %s1346_s15 = scalar_lea.vmem %s225_s10, 4096 }
  0x10   : > { %p1517_p7 = pnand %p1287_p6, %p2008_p1  ;;  %p1347_p9 = scmp.ne.s32.totalorder %s225_s10, %s1346_s15 }
  0x11   : > { %p1354_p12 = scmp.lt.s32.totalorder %s225_s10, %s225_s10  ;;  %p1355_p13 = scmp.lt.s32.totalorder %s1346_s15, %s1346_s15 }
  0x12   : > { %p1337_p8 = pneg %p1517_p7 }
  0x13   : > { %p1356_p0 = por %p1355_p13, %p1354_p12 }
  0x14   : > { %p1349_p10 = pnand %p1347_p9, %p1337_p8 }
  0x16   : > { %p1350_p11 = pneg %p1349_p10 }
  0x18   : > { %p1357_p2 = pnand %p1356_p0, %p1350_p11 }
  0x1a   : > { %1360 = shalt.err (!%p1357_p2)
}
  0x1b   : > { %s1430_s16 = smov 128   ;;  %s1431_s17 = smov 8  }
  0x1c   : > { %1290 = dma.hbm_to_vmem [thread:$0]  (!%p1517_p7), %s2003_s3, 4096, %s225_s10, [#allocation6], %s1430_s16, %s1430_s16, %s1431_s17  }
  0x1d   : > { %p28_p3 = scmp.eq.s32.totalorder %s27_s14, 0  ;;  %p37_p6 = scmp.ne.s32.totalorder %s1423_s28, %s1419_s27 }
  0x1e   : > { %p38_p8 = scmp.eq.s32.totalorder %s1427_s29, 0  ;;  %p1296_p9 = scmp.lt.s32.totalorder %s1427_s29, 2 }
  0x1f   : > { %s1542_s20 = scalar_select %p28_p3, %s1423_s28, %s30_s13  }
  0x20   : > { %p39_p10 = por %p38_p8, %p37_p6  ;;  %s247_s21 = sand.u32 1, %s1423_s28  }
  0x21   : > { %s1278_s22 = smul.u32 320, %s247_s21  ;;  %s1557_s13 = scalar_lea.sflag [#allocation4], %s247_s21 }
  0x22   : > { %s1279_s23 = smul.u32 5120, %s1427_s29  ;;  %p1546_p11 = pnand %p1296_p9, %p39_p10 }
  0x23   : > { %s251_s10 = scalar_lea.vmem [#allocation3], %s1278_s22  ;;  %s1366_s18 = scalar_lea.hbm %s2000_s0, 10240 }
  0x24   : > { %s1553_s9 = scalar_lea.hbm %s2000_s0, %s1279_s23  ;;  %s258_s11 = sshll.u32 %s251_s10, 4  ;;  %s1555_s11 = int_to_ptr.vmem [resolvable:$true] %s258_s11 }
  0x25   : > { %s1361_s29 = scalar_lea.hbm %s1553_s9, 5120  ;;  %p1363_p12 = pneg %p1546_p11 }
  0x26   : > { %p1362_p7 = scmp.ne.s32.totalorder %s1553_s9, %s1361_s29  ;;  %p1367_p2 = scmp.lt.s32.totalorder %s1553_s9, %s2000_s0 }
  0x27   : > { %p1368_p3 = scmp.lt.s32.totalorder %s1366_s18, %s1361_s29 }
  0x28   : > { %p1364_p13 = pnand %p1363_p12, %p1362_p7 }
  0x29   : > { %p1369_p6 = por %p1368_p3, %p1367_p2 }
  0x2a   : > { %p1365_p0 = pneg %p1364_p13 }
  0x2c   : > { %p1370_p8 = pnand %p1369_p6, %p1365_p0 }
  0x2e   : > { %1373 = shalt.err (!%p1370_p8)
}
  0x2f   : > { %s1374_s21 = scalar_lea.vmem %s1555_s11, 5120  ;;  %s1432_s22 = smov [#allocation3]  }
  0x30   : > { %p1375_p9 = scmp.ne.s32.totalorder %s1555_s11, %s1374_s21  ;;  %s1379_s25 = sshll.u32 %s1432_s22, 4  ;;  %s1380_s25 = int_to_ptr.vmem [resolvable:$false] %s1379_s25 }
  0x31   : > { %s1381_s26 = scalar_lea.vmem %s1380_s25, 10240  ;;  %p1382_p13 = scmp.lt.s32.totalorder %s1555_s11, %s1380_s25 }
  0x32   : > { %p1377_p10 = pnand %p1375_p9, %p1363_p12  ;;  %p1383_p1 = scmp.lt.s32.totalorder %s1381_s26, %s1374_s21 }
  0x34   : > { %p1378_p7 = pneg %p1377_p10  ;;  %p1384_p4 = por %p1383_p1, %p1382_p13 }
  0x36   : > { %p1385_p5 = pnand %p1384_p4, %p1378_p7 }
  0x38   : > { %1388 = shalt.err (!%p1385_p5)
}
  0x39   : > { %1294 = dma.hbm_to_vmem [thread:$0]  (!%p1546_p11), %s1553_s9, 5120, %s1555_s11, %s1557_s13, %s1430_s16, %s1430_s16, %s1431_s17  }
  0x3a   : > { %p2023_p12 = scmp.ne.s32.totalorder %s2020_s8, 0 }
  0x3b   : > { %s272_s10 = sand.u32 (!%p2023_p12), 1, %s1419_s27   ;;  %p2024_p1 = scmp.ne.s32.totalorder (!%p2023_p12), %s2019_s30, 0 }
  0x3c   : > { %270 = sbr.rel (%p2023_p12) target bundleno = 793 (0x319), region = 48  ;;  %s273_s14 = scalar_lea.sflag (!%p2023_p12), [#allocation4], %s272_s10 }
  0x3d   : > { %s1280_s29 = smul.u32 (!%p2023_p12), 320, %s272_s10 }
  0x3f   : > { %s1584_s15 = scalar_lea.vmem (!%p2023_p12), [#allocation3], %s1280_s29 }
  0x41   : > { %1406 = dma.done.wait (%p2024_p1), %s273_s14, 5120  }
  0x42   : > { %1408 = vsyncadd (%p2024_p1), %s273_s14, 4294962176  ;;  %p2025_p4 = scmp.eq.s32.totalorder %s1497_s6, 0 }
  0x44   : > { %1410 = dma.done.wait (%p2025_p4), [#allocation6], 4096   ;;  %p2026_p5 = pmov %p2025_p4 }
  0x45   : > { %v367_v1 = vld [vmem:[%s2001_s1 + $0x78] sm:$0xff]  ;;  %v366_v2 = vld [vmem:[%s2001_s1 + $0x70] sm:$0xff]  ;;  %v365_v3 = vld [vmem:[%s2001_s1 + $0x68] sm:$0xff]  ;;  %vm1434_vm0 = vmmov 0   ;;  %p309_p11 = scmp.lt.s32.totalorder %s1497_s6, 1  ;;  %vm962_vm1 = vcmask 0  }
  0x46   : > { %1412 = vsyncadd (%p2026_p5), [#allocation6], 4294963200  ;;  %1151 = vmatprep.subr.mxu0 %v367_v1  ;;  %v364_v4 = vld [vmem:[%s2001_s1 + $0x60] sm:$0xff]  ;;  %v363_v6 = vld [vmem:[%s2001_s1 + $0x58] sm:$0xff] }
  0x47   : > { %1152 = vmatpush3.msra.mxu0 %v367_v1  ;;  %v312_v5 = vld [vmem:[%s1584_s15] sm:$0xff]  ;;  %v362_v7 = vld [vmem:[%s2001_s1 + $0x50] sm:$0xff]  ;;  %v359_v10 = vld [vmem:[%s2001_s1 + $0x38] sm:$0xff]  ;;  %s2039_s6 = smov (!%p309_p11, %s1497_s6), 1 }
  0x48   : > { %1153 = vmatprep.subr.mxu0 %v366_v2  ;;  %1183 = vmatprep.mubr.f32.mxu0 %v312_v5  ;;  %v361_v8 = vld [vmem:[%s2001_s1 + $0x48] sm:$0xff]  ;;  %v360_v9 = vld [vmem:[%s2001_s1 + $0x40] sm:$0xff]  ;;  %v358_v11 = vld [vmem:[%s2001_s1 + $0x30] sm:$0xff] }
  0x49   : > { %1154 = vmatpush3.msra.mxu0 %v366_v2  ;;  %v357_v12 = vld [vmem:[%s2001_s1 + $0x28] sm:$0xff]  ;;  %v356_v13 = vld [vmem:[%s2001_s1 + $0x20] sm:$0xff]  ;;  %v355_v14 = vld [vmem:[%s2001_s1 + $0x18] sm:$0xff] }
  0x4a   : > { %1155 = vmatprep.subr.mxu0 %v365_v3  ;;  %v354_v15 = vld [vmem:[%s2001_s1 + $0x10] sm:$0xff]  ;;  %v353_v16 = vld [vmem:[%s2001_s1 + $0x8] sm:$0xff]  ;;  %v352_v17 = vld [vmem:[%s2001_s1] sm:$0xff] }
  0x4b   : > { %1156 = vmatpush3.msra.mxu0 %v365_v3  ;;  %v313_v18 = vld [vmem:[%s1584_s15 + $0x8] sm:$0xff]  ;;  %v314_v19 = vld [vmem:[%s1584_s15 + $0x10] sm:$0xff]  ;;  %v315_v20 = vld [vmem:[%s1584_s15 + $0x18] sm:$0xff] }
  0x4c   : > { %1157 = vmatprep.subr.mxu0 %v364_v4  ;;  %v316_v21 = vld [vmem:[%s1584_s15 + $0x20] sm:$0xff]  ;;  %v317_v22 = vld [vmem:[%s1584_s15 + $0x28] sm:$0xff]  ;;  %v318_v23 = vld [vmem:[%s1584_s15 + $0x30] sm:$0xff] }
  0x4d   : > { %1158 = vmatpush3.msra.mxu0 %v364_v4  ;;  %v319_v24 = vld [vmem:[%s1584_s15 + $0x38] sm:$0xff]  ;;  %v320_v25 = vld [vmem:[%s1584_s15 + $0x40] sm:$0xff]  ;;  %v321_v26 = vld [vmem:[%s1584_s15 + $0x48] sm:$0xff] }
  0x4e   : > { %1159 = vmatprep.subr.mxu0 %v363_v6  ;;  %v322_v27 = vld [vmem:[%s1584_s15 + $0x50] sm:$0xff]  ;;  %v323_v28 = vld [vmem:[%s1584_s15 + $0x58] sm:$0xff]  ;;  %v324_v29 = vld [vmem:[%s1584_s15 + $0x60] sm:$0xff] }
  0x4f   : > { %1160 = vmatpush3.msra.mxu0 %v363_v6  ;;  %v325_v30 = vld [vmem:[%s1584_s15 + $0x68] sm:$0xff]  ;;  %v326_v31 = vld [vmem:[%s1584_s15 + $0x70] sm:$0xff]  ;;  %v327_v32 = vld [vmem:[%s1584_s15 + $0x78] sm:$0xff] }
  0x50   : > { %1161 = vmatprep.subr.mxu0 %v362_v7  ;;  %v328_v33 = vld [vmem:[%s1584_s15 + $0x80] sm:$0xff]  ;;  %v329_v34 = vld [vmem:[%s1584_s15 + $0x88] sm:$0xff]  ;;  %v330_v35 = vld [vmem:[%s1584_s15 + $0x90] sm:$0xff] }
  0x51   : > { %1162 = vmatpush3.msra.mxu0 %v362_v7  ;;  %v331_v36 = vld [vmem:[%s1584_s15 + $0x98] sm:$0xff]  ;;  %v332_v37 = vld [vmem:[%s1584_s15 + $0xa0] sm:$0xff]  ;;  %v333_v38 = vld [vmem:[%s1584_s15 + $0xa8] sm:$0xff] }
  0x52   : > { %1163 = vmatprep.subr.mxu0 %v361_v8  ;;  %v334_v39 = vld [vmem:[%s1584_s15 + $0xb0] sm:$0xff]  ;;  %v335_v40 = vld [vmem:[%s1584_s15 + $0xb8] sm:$0xff]  ;;  %v336_v41 = vld [vmem:[%s1584_s15 + $0xc0] sm:$0xff] }
  0x53   : > { %1164 = vmatpush3.msra.mxu0 %v361_v8  ;;  %v337_v42 = vld [vmem:[%s1584_s15 + $0xc8] sm:$0xff]  ;;  %v338_v43 = vld [vmem:[%s1584_s15 + $0xd0] sm:$0xff]  ;;  %v339_v44 = vld [vmem:[%s1584_s15 + $0xd8] sm:$0xff] }
  0x54   : > { %1165 = vmatprep.subr.mxu0 %v360_v9  ;;  %v340_v45 = vld [vmem:[%s1584_s15 + $0xe0] sm:$0xff]  ;;  %v341_v46 = vld [vmem:[%s1584_s15 + $0xe8] sm:$0xff]  ;;  %v342_v47 = vld [vmem:[%s1584_s15 + $0xf0] sm:$0xff] }
  0x55   : > { %1166 = vmatpush3.msra.mxu0 %v360_v9  ;;  %v343_v48 = vld [vmem:[%s1584_s15 + $0xf8] sm:$0xff]  ;;  %v344_v49 = vld [vmem:[%s1584_s15 + $0x100] sm:$0xff]  ;;  %v345_v50 = vld [vmem:[%s1584_s15 + $0x108] sm:$0xff] }
  0x56   : > { %1167 = vmatprep.subr.mxu0 %v359_v10  ;;  %v346_v51 = vld [vmem:[%s1584_s15 + $0x110] sm:$0xff]  ;;  %v347_v52 = vld [vmem:[%s1584_s15 + $0x118] sm:$0xff]  ;;  %v348_v53 = vld [vmem:[%s1584_s15 + $0x120] sm:$0xff] }
  0x57   : > { %1168 = vmatpush3.msra.mxu0 %v359_v10  ;;  %v349_v54 = vld [vmem:[%s1584_s15 + $0x128] sm:$0xff]  ;;  %v350_v55 = vld [vmem:[%s1584_s15 + $0x130] sm:$0xff]  ;;  %v351_v56 = vld [vmem:[%s1584_s15 + $0x138] sm:$0xff]  ;;  %s311_s15 = scalar_lea.vmem %s2007_s7, %s2039_s6 }
  0x58   : > { %1169 = vmatprep.subr.mxu0 %v358_v11  ;;  %v802_v57 = vld [vmem:[#allocation5 + $0xf8] sm:$0xff]  ;;  %v801_v59 = vld [vmem:[#allocation5 + $0xf0] sm:$0xff]  ;;  %v800_v61 = vld [vmem:[#allocation5 + $0xe8] sm:$0xff] }
  0x59   : > { %1170 = vmatpush3.msra.mxu0 %v358_v11  ;;  %1099 = vmatprep.subr.mxu1 %v802_v57  ;;  %v786_v58 = vld [vmem:[#allocation5 + $0x78] sm:$0xff]  ;;  %v785_v60 = vld [vmem:[#allocation5 + $0x70] sm:$0xff]  ;;  %v784_v62 = vld [vmem:[#allocation5 + $0x68] sm:$0xff] }
  0x5a   : > { %1171 = vmatprep.subr.mxu0 %v357_v12  ;;  %1100 = vmatpush3.msra.mxu1 %v786_v58  ;;  %v799_v63 = vld [vmem:[#allocation5 + $0xe0] sm:$0xff]  ;;  %v798_v1 = vld [vmem:[#allocation5 + $0xd8] sm:$0xff]  ;;  %v797_v3 = vld [vmem:[#allocation5 + $0xd0] sm:$0xff] }
  0x5b   : > { %1172 = vmatpush3.msra.mxu0 %v357_v12  ;;  %1101 = vmatprep.subr.mxu1 %v801_v59  ;;  %v783_v0 = vld [vmem:[#allocation5 + $0x60] sm:$0xff]  ;;  %v782_v2 = vld [vmem:[#allocation5 + $0x58] sm:$0xff]  ;;  %v781_v4 = vld [vmem:[#allocation5 + $0x50] sm:$0xff] }
  0x5c   : > { %1173 = vmatprep.subr.mxu0 %v356_v13  ;;  %1102 = vmatpush3.msra.mxu1 %v785_v60  ;;  %v796_v5 = vld [vmem:[#allocation5 + $0xc8] sm:$0xff]  ;;  %v795_v7 = vld [vmem:[#allocation5 + $0xc0] sm:$0xff]  ;;  %v794_v9 = vld [vmem:[#allocation5 + $0xb8] sm:$0xff] }
  0x5d   : > { %1174 = vmatpush3.msra.mxu0 %v356_v13  ;;  %1103 = vmatprep.subr.mxu1 %v800_v61  ;;  %v780_v6 = vld [vmem:[#allocation5 + $0x48] sm:$0xff]  ;;  %v779_v8 = vld [vmem:[#allocation5 + $0x40] sm:$0xff]  ;;  %v778_v10 = vld [vmem:[#allocation5 + $0x38] sm:$0xff] }
  0x5e   : > { %1175 = vmatprep.subr.mxu0 %v355_v14  ;;  %1104 = vmatpush3.msra.mxu1 %v784_v62  ;;  %v793_v11 = vld [vmem:[#allocation5 + $0xb0] sm:$0xff]  ;;  %v792_v13 = vld [vmem:[#allocation5 + $0xa8] sm:$0xff] }
  0x5f   : > { %1176 = vmatpush3.msra.mxu0 %v355_v14  ;;  %1105 = vmatprep.subr.mxu1 %v799_v63  ;;  %v777_v12 = vld [vmem:[#allocation5 + $0x30] sm:$0xff]  ;;  %v776_v14 = vld [vmem:[#allocation5 + $0x28] sm:$0xff] }
  0x60   : > { %1177 = vmatprep.subr.mxu0 %v354_v15  ;;  %1106 = vmatpush3.msra.mxu1 %v783_v0 }
  0x61   : > { %1178 = vmatpush3.msra.mxu0 %v354_v15  ;;  %1107 = vmatprep.subr.mxu1 %v798_v1  ;;  %v791_v15 = vld [vmem:[#allocation5 + $0xa0] sm:$0xff] }
  0x62   : > { %1179 = vmatprep.subr.mxu0 %v353_v16  ;;  %1108 = vmatpush3.msra.mxu1 %v782_v2 }
  0x63   : > { %1180 = vmatpush3.msra.mxu0 %v353_v16  ;;  %1109 = vmatprep.subr.mxu1 %v797_v3  ;;  %v775_v16 = vld [vmem:[#allocation5 + $0x20] sm:$0xff] }
  0x64   : > { %1181 = vmatprep.subr.mxu0 %v352_v17  ;;  %1110 = vmatpush3.msra.mxu1 %v781_v4 }
  0x65   : > { %1182 = vmatpush3.msra.mxu0 %v352_v17  ;;  %1111 = vmatprep.subr.mxu1 %v796_v5  ;;  %v790_v17 = vld [vmem:[#allocation5 + $0x98] sm:$0xff] }
  0x66   : > { %1184 = vmatmul.mubr.f32.vlgmr.msra.gmra.mxu0 %v313_v18  ;;  %1112 = vmatpush3.msra.mxu1 %v780_v6  ;;  %v774_v18 = vld [vmem:[#allocation5 + $0x18] sm:$0xff] }
  0x67   : > { %1186 = vmatprep.mubr.f32.mxu0 %v314_v19  ;;  %1113 = vmatprep.subr.mxu1 %v795_v7  ;;  %v789_v19 = vld [vmem:[#allocation5 + $0x90] sm:$0xff] }
  0x68   : > { %1114 = vmatpush3.msra.mxu1 %v779_v8 }
  0x69   : > { %1115 = vmatprep.subr.mxu1 %v794_v9 }
  0x6a   : > { %1187 = vmatmul.mubr.f32.gmra.mxu0 %v315_v20  ;;  %1116 = vmatpush3.msra.mxu1 %v778_v10  ;;  %v773_v20 = vld [vmem:[#allocation5 + $0x10] sm:$0xff] }
  0x6b   : > { %1189 = vmatprep.mubr.f32.mxu0 %v316_v21  ;;  %1117 = vmatprep.subr.mxu1 %v793_v11  ;;  %v788_v21 = vld [vmem:[#allocation5 + $0x88] sm:$0xff] }
  0x6c   : > { %1118 = vmatpush3.msra.mxu1 %v777_v12 }
  0x6d   : > { %1119 = vmatprep.subr.mxu1 %v792_v13 }
  0x6e   : > { %1190 = vmatmul.mubr.f32.gmra.mxu0 %v317_v22  ;;  %1120 = vmatpush3.msra.mxu1 %v776_v14  ;;  %v772_v22 = vld [vmem:[#allocation5 + $0x8] sm:$0xff] }
  0x6f   : > { %1192 = vmatprep.mubr.f32.mxu0 %v318_v23  ;;  %1121 = vmatprep.subr.mxu1 %v791_v15  ;;  %v787_v23 = vld [vmem:[#allocation5 + $0x80] sm:$0xff] }
  0x70   : > { %1122 = vmatpush3.msra.mxu1 %v775_v16 }
  0x71   : > { %1123 = vmatprep.subr.mxu1 %v790_v17 }
  0x72   : > { %1193 = vmatmul.mubr.f32.gmra.mxu0 %v319_v24  ;;  %1124 = vmatpush3.msra.mxu1 %v774_v18  ;;  %v771_v24 = vld [vmem:[#allocation5] sm:$0xff] }
  0x73   : > { %1195 = vmatprep.mubr.f32.mxu0 %v320_v25  ;;  %1125 = vmatprep.subr.mxu1 %v789_v19  ;;  %v2011_v25 = vmov 0.0  }
  0x74   : > { %1126 = vmatpush3.msra.mxu1 %v773_v20 }
  0x75   : > { %1127 = vmatprep.subr.mxu1 %v788_v21 }
  0x76   : > { %1196 = vmatmul.mubr.f32.gmra.mxu0 %v321_v26  ;;  %1128 = vmatpush3.msra.mxu1 %v772_v22 }
  0x77   : > { %1198 = vmatprep.mubr.f32.mxu0 %v322_v27  ;;  %1129 = vmatprep.subr.mxu1 %v787_v23  ;;  %v1686_v27 = vld [vmem:[%s2002_s2] ss:$0 sm:$0xff] }
  0x78   : > { %1130 = vmatpush3.msra.mxu1 %v771_v24 }
  0x79   : > { %1243 = vmatprep.subr.mxu1 %v2011_v25 }
  0x7a   : > { %1199 = vmatmul.mubr.f32.gmra.mxu0 %v323_v28 }
  0x7b   : > { %1201 = vmatprep.mubr.f32.mxu0 %v324_v29 }
  0x7e   : > { %1202 = vmatmul.mubr.f32.gmra.mxu0 %v325_v30 }
  0x7f   : > { %1204 = vmatprep.mubr.f32.mxu0 %v326_v31 }
  0x82   : > { %1205 = vmatmul.mubr.f32.gmra.mxu0 %v327_v32 }
  0x83   : > { %1207 = vmatprep.mubr.f32.mxu0 %v328_v33 }
  0x86   : > { %1208 = vmatmul.mubr.f32.gmra.mxu0 %v329_v34 }
  0x87   : > { %1210 = vmatprep.mubr.f32.mxu0 %v330_v35 }
  0x8a   : > { %1211 = vmatmul.mubr.f32.gmra.mxu0 %v331_v36 }
  0x8b   : > { %1213 = vmatprep.mubr.f32.mxu0 %v332_v37 }
  0x8e   : > { %1214 = vmatmul.mubr.f32.gmra.mxu0 %v333_v38 }
  0x8f   : > { %1216 = vmatprep.mubr.f32.mxu0 %v334_v39 }
  0x92   : > { %1217 = vmatmul.mubr.f32.gmra.mxu0 %v335_v40 }
  0x93   : > { %1219 = vmatprep.mubr.f32.mxu0 %v336_v41 }
  0x96   : > { %1220 = vmatmul.mubr.f32.gmra.mxu0 %v337_v42 }
  0x97   : > { %1222 = vmatprep.mubr.f32.mxu0 %v338_v43 }
  0x9a   : > { %1223 = vmatmul.mubr.f32.gmra.mxu0 %v339_v44 }
  0x9b   : > { %1225 = vmatprep.mubr.f32.mxu0 %v340_v45 }
  0x9e   : > { %1226 = vmatmul.mubr.f32.gmra.mxu0 %v341_v46 }
  0x9f   : > { %1228 = vmatprep.mubr.f32.mxu0 %v342_v47 }
  0xa2   : > { %1229 = vmatmul.mubr.f32.gmra.mxu0 %v343_v48 }
  0xa3   : > { %1231 = vmatprep.mubr.f32.mxu0 %v344_v49 }
  0xa6   : > { %1232 = vmatmul.mubr.f32.gmra.mxu0 %v345_v50 }
  0xa7   : > { %1234 = vmatprep.mubr.f32.mxu0 %v346_v51 }
  0xaa   : > { %1235 = vmatmul.mubr.f32.gmra.mxu0 %v347_v52 }
  0xab   : > { %1237 = vmatprep.mubr.f32.mxu0 %v348_v53 }
  0xae   : > { %1238 = vmatmul.mubr.f32.gmra.mxu0 %v349_v54 }
  0xaf   : > { %1240 = vmatprep.mubr.f32.mxu0 %v350_v55 }
  0xb2   : > { %1241 = vmatmul.mubr.f32.gmra.mxu0 %v351_v56 }
 0x126   : > { %v1185_v26 = vpop.f32.mrf.mxu0 }
 0x127   : > { %v1689_v29 = vadd.f32 %v1185_v26, %v1686_v27 }
 0x128   : > { %v441_v28 = vpop.f32.mrf.mxu0 }
 0x129   : > { %v1692_v30 = vadd.f32 %v1686_v27, %v441_v28  ;;  %v641_v34 = vmax.f32 %v1689_v29, 0.0 }
 0x12a   : > { %v1188_v31 = vpop.f32.mrf.mxu0 }
 0x12b   : > { %v640_v32 = vmax.f32 %v1692_v30, 0.0  ;;  %v1697_v35 = vadd.f32 %v1188_v31, %v1686_v27 }
 0x12c   : > { %v451_v33 = vpop.f32.mrf.mxu0 }
 0x12d   : > { %v1700_v36 = vadd.f32 %v1686_v27, %v451_v33  ;;  %v725_v38 = vadd.f32 %v641_v34, %v640_v32  ;;  %v643_v41 = vmax.f32 %v1697_v35, 0.0 }
 0x12e   : > { %v1191_v37 = vpop.f32.mrf.mxu0 }
 0x12f   : > { %v642_v39 = vmax.f32 %v1700_v36, 0.0  ;;  %v1711_v43 = vadd.f32 %v1191_v37, %v1686_v27 }
 0x130   : > { %v461_v40 = vpop.f32.mrf.mxu0 }
 0x131   : > { %v726_v42 = vadd.f32 %v725_v38, %v642_v39  ;;  %v1714_v44 = vadd.f32 %v1686_v27, %v461_v40  ;;  %v645_v49 = vmax.f32 %v1711_v43, 0.0 }
 0x132   : > { %v1194_v45 = vpop.f32.mrf.mxu0 }
 0x133   : > { %v644_v46 = vmax.f32 %v1714_v44, 0.0  ;;  %v727_v47 = vadd.f32 %v726_v42, %v643_v41  ;;  %v1723_v51 = vadd.f32 %v1194_v45, %v1686_v27 }
 0x134   : > { %v471_v48 = vpop.f32.mrf.mxu0 }
 0x135   : > { %v728_v50 = vadd.f32 %v727_v47, %v644_v46  ;;  %v1726_v52 = vadd.f32 %v1686_v27, %v471_v48  ;;  %v647_v57 = vmax.f32 %v1723_v51, 0.0 }
 0x136   : > { %v1197_v53 = vpop.f32.mrf.mxu0 }
 0x137   : > { %v646_v54 = vmax.f32 %v1726_v52, 0.0  ;;  %v729_v55 = vadd.f32 %v728_v50, %v645_v49  ;;  %v1735_v59 = vadd.f32 %v1197_v53, %v1686_v27 }
 0x138   : > { %v481_v56 = vpop.f32.mrf.mxu0 }
 0x139   : > { %v730_v58 = vadd.f32 %v729_v55, %v646_v54  ;;  %v1738_v60 = vadd.f32 %v1686_v27, %v481_v56  ;;  %v649_v1 = vmax.f32 %v1735_v59, 0.0  ;;  %v682_v44 = vmax.f32 %v642_v39, %v646_v54 }
 0x13a   : > { %v1200_v61 = vpop.f32.mrf.mxu0 }
 0x13b   : > { %v648_v62 = vmax.f32 %v1738_v60, 0.0  ;;  %v731_v63 = vadd.f32 %v730_v58, %v647_v57  ;;  %v1747_v3 = vadd.f32 %v1200_v61, %v1686_v27 }
 0x13c   : > { %v491_v0 = vpop.f32.mrf.mxu0 }
 0x13d   : > { %v732_v2 = vadd.f32 %v731_v63, %v648_v62  ;;  %v1750_v4 = vadd.f32 %v1686_v27, %v491_v0  ;;  %v651_v9 = vmax.f32 %v1747_v3, 0.0 }
 0x13e   : > { %v1203_v5 = vpop.f32.mrf.mxu0 }
 0x13f   : > { %v650_v6 = vmax.f32 %v1750_v4, 0.0  ;;  %v733_v7 = vadd.f32 %v732_v2, %v649_v1  ;;  %v1759_v11 = vadd.f32 %v1203_v5, %v1686_v27 }
 0x140   : > { %v501_v8 = vpop.f32.mrf.mxu0 }
 0x141   : > { %v734_v10 = vadd.f32 %v733_v7, %v650_v6  ;;  %v1762_v12 = vadd.f32 %v1686_v27, %v501_v8  ;;  %v653_v17 = vmax.f32 %v1759_v11, 0.0  ;;  %v686_v36 = vmax.f32 %v682_v44, %v650_v6 }
 0x142   : > { %v1206_v13 = vpop.f32.mrf.mxu0 }
 0x143   : > { %v652_v14 = vmax.f32 %v1762_v12, 0.0  ;;  %v735_v15 = vadd.f32 %v734_v10, %v651_v9  ;;  %v1771_v19 = vadd.f32 %v1206_v13, %v1686_v27 }
 0x144   : > { %v511_v16 = vpop.f32.mrf.mxu0 }
 0x145   : > { %v736_v18 = vadd.f32 %v735_v15, %v652_v14  ;;  %v1774_v20 = vadd.f32 %v1686_v27, %v511_v16  ;;  %v655_v26 = vmax.f32 %v1771_v19, 0.0 }
 0x146   : > { %v1209_v21 = vpop.f32.mrf.mxu0 }
 0x147   : > { %v654_v22 = vmax.f32 %v1774_v20, 0.0  ;;  %v737_v23 = vadd.f32 %v736_v18, %v653_v17  ;;  %v1783_v31 = vadd.f32 %v1209_v21, %v1686_v27 }
 0x148   : > { %v521_v24 = vpop.f32.mrf.mxu0 }
 0x149   : > { %v738_v28 = vadd.f32 %v737_v23, %v654_v22  ;;  %v1786_v33 = vadd.f32 %v1686_v27, %v521_v24  ;;  %v657_v45 = vmax.f32 %v1783_v31, 0.0 }
 0x14a   : > { %v1212_v37 = vpop.f32.mrf.mxu0 }
 0x14b   : > { %v656_v38 = vmax.f32 %v1786_v33, 0.0  ;;  %v739_v40 = vadd.f32 %v738_v28, %v655_v26  ;;  %v1795_v48 = vadd.f32 %v1212_v37, %v1686_v27 }
 0x14c   : > { %v531_v42 = vpop.f32.mrf.mxu0 }
 0x14d   : > { %v740_v47 = vadd.f32 %v739_v40, %v656_v38  ;;  %v1798_v50 = vadd.f32 %v1686_v27, %v531_v42  ;;  %v659_v61 = vmax.f32 %v1795_v48, 0.0 }
 0x14e   : > { %v1215_v53 = vpop.f32.mrf.mxu0 }
 0x14f   : > { %v2017_v55 = vmax.f32 %v1798_v50, 0.0  ;;  %v741_v56 = vadd.f32 %v740_v47, %v657_v45  ;;  %v1807_v0 = vadd.f32 %v1215_v53, %v1686_v27  ;;  %v2027_v11 = vmax.f32 %v1798_v50, 0.0 }
 0x150   : > { %v541_v58 = vpop.f32.mrf.mxu0 }
 0x151   : > { %v742_v63 = vadd.f32 %v741_v56, %v2017_v55  ;;  %v1810_v2 = vadd.f32 %v1686_v27, %v541_v58  ;;  %v2015_v13 = vmax.f32 %v1807_v0, 0.0 }
 0x152   : > { %v1218_v5 = vpop.f32.mrf.mxu0 }
 0x153   : > { %v2016_v7 = vmax.f32 %v1810_v2, 0.0  ;;  %v743_v8 = vadd.f32 %v742_v63, %v659_v61  ;;  %v1819_v16 = vadd.f32 %v1218_v5, %v1686_v27 }
 0x154   : > { %v551_v10 = vpop.f32.mrf.mxu0 }
 0x155   : > { %v744_v15 = vadd.f32 %v743_v8, %v2016_v7  ;;  %v1822_v18 = vadd.f32 %v1686_v27, %v551_v10  ;;  %v2014_v37 = vmax.f32 %v1819_v16, 0.0 }
 0x156   : > { %v1221_v21 = vpop.f32.mrf.mxu0 }
 0x157   : > { %v2013_v23 = vmax.f32 %v1822_v18, 0.0  ;;  %v745_v24 = vadd.f32 %v744_v15, %v2015_v13  ;;  %v1831_v42 = vadd.f32 %v1221_v21, %v1686_v27  ;;  %v2031_v31 = vmax.f32 %v1822_v18, 0.0 }
 0x158   : > { %v561_v28 = vpop.f32.mrf.mxu0 }
 0x159   : > { %v746_v40 = vadd.f32 %v745_v24, %v2013_v23  ;;  %v1834_v47 = vadd.f32 %v1686_v27, %v561_v28  ;;  %v2018_v5 = vmax.f32 %v1831_v42, 0.0 }
 0x15a   : > { %v1224_v53 = vpop.f32.mrf.mxu0 }
 0x15b   : > { %v664_v56 = vmax.f32 %v1834_v47, 0.0  ;;  %v747_v58 = vadd.f32 %v746_v40, %v2014_v37  ;;  %v1841_v10 = vadd.f32 %v1224_v53, %v1686_v27 }
 0x15c   : > { %v571_v63 = vpop.f32.mrf.mxu0 }
 0x15d   : > { %v748_v8 = vadd.f32 %v747_v58, %v664_v56  ;;  %v1844_v15 = vadd.f32 %v1686_v27, %v571_v63  ;;  %v667_v25 = vmax.f32 %v1841_v10, 0.0  ;;  %v680_v10 = vmax.f32 %v640_v32, %v644_v46 }
 0x15e   : > { %v1227_v21 = vpop.f32.mrf.mxu0 }
 0x15f   : > { %v666_v24 = vmax.f32 %v1844_v15, 0.0  ;;  %v749_v28 = vadd.f32 %v748_v8, %v2018_v5  ;;  %v1851_v23 = vadd.f32 %v1227_v21, %v1686_v27  ;;  %v684_v30 = vmax.f32 %v680_v10, %v648_v62 }
 0x160   : > { %v581_v47 = vpop.f32.mrf.mxu0 }
 0x161   : > { %v750_v40 = vadd.f32 %v749_v28, %v666_v24  ;;  %v582_v58 = vadd.f32 %v1686_v27, %v581_v47  ;;  %v669_v7 = vmax.f32 %v1851_v23, 0.0  ;;  %v681_v47 = vmax.f32 %v641_v34, %v645_v49 }
 0x162   : > { %v1230_v53 = vpop.f32.mrf.mxu0  ;;  %v688_v39 = vmax.f32 %v684_v30, %v652_v14  ;;  %v2028_v14 = vmax.f32 %v1810_v2, 0.0 }
 0x163   : > { %v668_v37 = vmax.f32 %v582_v58, 0.0  ;;  %v751_v13 = vadd.f32 %v750_v40, %v667_v25  ;;  %v597_v15 = vadd.f32 %v1230_v53, %v1686_v27  ;;  %v685_v34 = vmax.f32 %v681_v47, %v649_v1 }
 0x164   : > { %v591_v63 = vpop.f32.mrf.mxu0  ;;  %v692_v59 = vmax.f32 %v688_v39, %v656_v38  ;;  %v2030_v38 = vmax.f32 %v1819_v16, 0.0  ;;  %v2032_v58 = vmax.f32 %v1831_v42, 0.0 }
 0x165   : > { %v752_v55 = vadd.f32 %v751_v13, %v668_v37  ;;  %v592_v8 = vadd.f32 %v1686_v27, %v591_v63  ;;  %v683_v13 = vmax.f32 %v643_v41, %v647_v57  ;;  %v671_v46 = vmax.f32 %v597_v15, 0.0 }
 0x166   : > { %v1233_v21 = vpop.f32.mrf.mxu0  ;;  %v689_v52 = vmax.f32 %v685_v34, %v653_v17  ;;  %v690_v57 = vmax.f32 %v686_v36, %v654_v22  ;;  %v696_v17 = vmax.f32 %v692_v59, %v2028_v14  ;;  %v2033_v14 = vmov 0.0  }
 0x167   : > { %v670_v28 = vmax.f32 %v592_v8, 0.0  ;;  %v753_v5 = vadd.f32 %v752_v55, %v669_v7  ;;  %v607_v43 = vadd.f32 %v1233_v21, %v1686_v27  ;;  %v687_v35 = vmax.f32 %v683_v13, %v651_v9 }
 0x168   : > { %v601_v32 = vpop.f32.mrf.mxu0  ;;  %v693_v6 = vmax.f32 %v689_v52, %v657_v45  ;;  %v694_v12 = vmax.f32 %v690_v57, %v2027_v11  ;;  %v700_v48 = vmax.f32 %v696_v17, %v664_v56  ;;  %v890_v11 = vld [vmem:[%s2005_s5 + $0x78] sm:$0xff]  ;;  %v888_v17 = vld [vmem:[%s2005_s5 + $0x68] sm:$0xff] }
 0x169   : > { %v754_v55 = vadd.f32 %v753_v5, %v670_v28  ;;  %v602_v29 = vadd.f32 %v1686_v27, %v601_v32  ;;  %v691_v54 = vmax.f32 %v687_v35, %v655_v26  ;;  %v673_v62 = vmax.f32 %v607_v43, 0.0 }
 0x16a   : > { %v1236_v41 = vpop.f32.mrf.mxu0  ;;  %v2029_v26 = vmax.f32 %v1807_v0, 0.0  ;;  %v698_v45 = vmax.f32 %v694_v12, %v2031_v31  ;;  %v704_v15 = vmax.f32 %v700_v48, %v668_v37  ;;  %v889_v12 = vld [vmem:[%s2005_s5 + $0x70] sm:$0xff]  ;;  %v880_v31 = vld [vmem:[%s2005_s5 + $0x28] sm:$0xff]  ;;  %v878_v48 = vld [vmem:[%s2005_s5 + $0x18] sm:$0xff] }
 0x16b   : > { %v672_v49 = vmax.f32 %v602_v29, 0.0  ;;  %v755_v51 = vadd.f32 %v754_v55, %v671_v46  ;;  %v617_v3 = vadd.f32 %v1236_v41, %v1686_v27  ;;  %v695_v9 = vmax.f32 %v691_v54, %v659_v61 }
 0x16c   : > { %v611_v60 = vpop.f32.mrf.mxu0  ;;  %v697_v33 = vmax.f32 %v693_v6, %v2029_v26  ;;  %v702_v0 = vmax.f32 %v698_v45, %v666_v24  ;;  %v884_v26 = vld [vmem:[%s2005_s5 + $0x48] sm:$0xff]  ;;  %v879_v45 = vld [vmem:[%s2005_s5 + $0x20] sm:$0xff] }
 0x16d   : > { %v756_v1 = vadd.f32 %v755_v51, %v672_v49  ;;  %v612_v4 = vadd.f32 %v1686_v27, %v611_v60  ;;  %v699_v23 = vmax.f32 %v695_v9, %v2030_v38  ;;  %v675_v5 = vmax.f32 %v617_v3, 0.0  ;;  %v882_v38 = vld [vmem:[%s2005_s5 + $0x38] sm:$0xff] }
 0x16e   : > { %v1239_v19 = vpop.f32.mrf.mxu0  ;;  %v701_v53 = vmax.f32 %v697_v33, %v2032_v58  ;;  %v706_v47 = vmax.f32 %v702_v0, %v670_v28  ;;  %v708_v13 = vmax.f32 %v704_v15, %v672_v49  ;;  %v883_v33 = vld [vmem:[%s2005_s5 + $0x40] sm:$0xff] }
 0x16f   : > { %v674_v20 = vmax.f32 %v612_v4, 0.0  ;;  %v757_v22 = vadd.f32 %v756_v1, %v673_v62  ;;  %v627_v40 = vadd.f32 %v1239_v19, %v1686_v27  ;;  %v703_v63 = vmax.f32 %v699_v23, %v667_v25  ;;  %v887_v19 = vld [vmem:[%s2005_s5 + $0x60] sm:$0xff]  ;;  %v881_v23 = vld [vmem:[%s2005_s5 + $0x30] sm:$0xff] }
 0x170   : > { %v621_v61 = vpop.f32.mrf.mxu0  ;;  %v705_v21 = vmax.f32 %v701_v53, %v669_v7  ;;  %v891_v15 = vld [vmem:[#allocation2] sm:$0x1] }
 0x171   : > { %v758_v50 = vadd.f32 %v757_v22, %v674_v20  ;;  %v622_v2 = vadd.f32 %v1686_v27, %v621_v61  ;;  %v707_v56 = vmax.f32 %v703_v63, %v671_v46  ;;  %v677_v30 = vmax.f32 %v627_v40, 0.0  ;;  %v885_v22 = vld [vmem:[%s2005_s5 + $0x50] sm:$0xff] }
 0x172   : > { %v1242_v8 = vpop.f32.mrf.mxu0  ;;  %v709_v42 = vmax.f32 %v705_v21, %v673_v62  ;;  %v710_v25 = vmax.f32 %v706_v47, %v674_v20  ;;  %v886_v20 = vld [vmem:[%s2005_s5 + $0x58] sm:$0xff]  ;;  %v877_v61 = vld [vmem:[%s2005_s5 + $0x10] sm:$0xff] }
 0x173   : > { %v676_v16 = vmax.f32 %v622_v2, 0.0  ;;  %v759_v10 = vadd.f32 %v758_v50, %v675_v5  ;;  %v637_v18 = vadd.f32 %v1242_v8, %v1686_v27  ;;  %v711_v29 = vmax.f32 %v707_v56, %v675_v5  ;;  %v876_v5 = vld [vmem:[%s2005_s5 + $0x8] sm:$0xff]  ;;  %v875_v50 = vld [vmem:[%s2005_s5] sm:$0xff] }
 0x174   : > { %v631_v44 = vpop.f32.mrf.mxu0  ;;  %v713_v35 = vmax.f32 %v709_v42, %v677_v30  ;;  %v803_v2 = vld [vmem:[%s2004_s4] sm:$0x1] }
 0x175   : > { %v760_v32 = vadd.f32 %v759_v10, %v676_v16  ;;  %v679_v55 = vmax.f32 %v637_v18, 0.0  ;;  %v632_v43 = vadd.f32 %v1686_v27, %v631_v44  ;;  %v712_v24 = vmax.f32 %v708_v13, %v676_v16 }
 0x177   : > { %v678_v37 = vmax.f32 %v632_v43, 0.0  ;;  %v761_v34 = vadd.f32 %v760_v32, %v677_v30  ;;  %v715_v36 = vmax.f32 %v711_v29, %v679_v55  ;;  %v716_v7 = vmax.f32 %v712_v24, %v713_v35 }
 0x179   : > { %v714_v39 = vmax.f32 %v710_v25, %v678_v37  ;;  %v762_v41 = vadd.f32 %v761_v34, %v678_v37 }
 0x17b   : > { %v717_v46 = vmax.f32 %v714_v39, %v715_v36  ;;  %v763_v28 = vadd.f32 %v762_v41, %v679_v55 }
 0x17d   : > { %v718_v49 = vmax.f32 %v716_v7, %v717_v46  ;;  %v764_v51 = vrot.slane %v763_v28, 4 }
 0x17f   : > { %v719_v52 = vrot.slane %v718_v49, 4  ;;  %v765_v54 = vadd.f32 %v764_v51, %v763_v28 }
 0x181   : > { %v766_v57 = vrot.slane %v765_v54, 2  ;;  %v720_v59 = vmax.f32 %v718_v49, %v719_v52 }
 0x183   : > { %v767_v27 = vadd.f32 %v766_v57, %v765_v54  ;;  %v721_v60 = vrot.slane %v720_v59, 2 }
 0x185   : > { %v768_v62 = vrot.slane %v767_v27, 1  ;;  %v722_v1 = vmax.f32 %v720_v59, %v721_v60 }
 0x187   : > { %v769_v3 = vadd.f32 %v768_v62, %v767_v27  ;;  %v723_v4 = vrot.slane %v722_v1, 1 }
 0x189   : > { %v770_v6 = vmul.f32 0.003125, %v769_v3  ;;  %v724_v9 = vmax.f32 %v722_v1, %v723_v4 }
 0x18b   : > { %868 = vmatprep.mubr.f32.mxu1 %v770_v6 }
 0x18c   : > { %869 = vmatmul.mubr.f32.vlgmr.msra.gmra.mxu1 %v724_v9 }
 0x18d   : > { %1244 = vmatpush3.msra.mxu1 %v890_v11  ;;  %1275 = vmatprep.mubr.msk.f32.mxu1 %vm1434_vm0, %v2033_v14 }
 0x18e   : > { %1245 = vmatprep.subr.mxu1 %v2033_v14 }
 0x18f   : > { %1246 = vmatpush3.msra.mxu1 %v889_v12 }
 0x190   : > { %1247 = vmatprep.subr.mxu1 %v2033_v14 }
 0x191   : > { %1248 = vmatpush3.msra.mxu1 %v888_v17 }
 0x192   : > { %1249 = vmatprep.subr.mxu1 %v2033_v14 }
 0x193   : > { %1250 = vmatpush3.msra.mxu1 %v887_v19 }
 0x194   : > { %1251 = vmatprep.subr.mxu1 %v2033_v14 }
 0x195   : > { %1252 = vmatpush3.msra.mxu1 %v886_v20 }
 0x196   : > { %1253 = vmatprep.subr.mxu1 %v2033_v14 }
 0x197   : > { %1254 = vmatpush3.msra.mxu1 %v885_v22 }
 0x198   : > { %1255 = vmatprep.subr.mxu1 %v2033_v14 }
 0x199   : > { %1256 = vmatpush3.msra.mxu1 %v884_v26 }
 0x19a   : > { %1257 = vmatprep.subr.mxu1 %v2033_v14 }
 0x19b   : > { %1258 = vmatpush3.msra.mxu1 %v883_v33 }
 0x19c   : > { %1259 = vmatprep.subr.mxu1 %v2033_v14 }
 0x19d   : > { %1260 = vmatpush3.msra.mxu1 %v882_v38 }
 0x19e   : > { %1261 = vmatprep.subr.mxu1 %v2033_v14 }
 0x19f   : > { %1262 = vmatpush3.msra.mxu1 %v881_v23 }
 0x1a0   : > { %1263 = vmatprep.subr.mxu1 %v2033_v14 }
 0x1a1   : > { %1264 = vmatpush3.msra.mxu1 %v880_v31 }
 0x1a2   : > { %1265 = vmatprep.subr.mxu1 %v2033_v14 }
 0x1a3   : > { %1266 = vmatpush3.msra.mxu1 %v879_v45 }
 0x1a4   : > { %1267 = vmatprep.subr.mxu1 %v2033_v14 }
 0x1a5   : > { %1268 = vmatpush3.msra.mxu1 %v878_v48 }
 0x1a6   : > { %1269 = vmatprep.subr.mxu1 %v2033_v14 }
 0x1a7   : > { %1270 = vmatpush3.msra.mxu1 %v877_v61 }
 0x1a8   : > { %1271 = vmatprep.subr.mxu1 %v2033_v14 }
 0x1a9   : > { %1272 = vmatpush3.msra.mxu1 %v876_v5 }
 0x1aa   : > { %1273 = vmatprep.subr.mxu1 %v2033_v14 }
 0x1ab   : > { %1274 = vmatpush3.msra.mxu1 %v875_v50 }
 0x24c   : > { %v1131_v40 = vpop.f32.mrf.mxu1 }
 0x24e   : > { %v1132_v58 = vpop.f32.mrf.mxu1 }
 0x24f   : > { %v1133_v53 = vadd.f32 %v1132_v58, %v1131_v40 }
 0x251   : > { %v871_v63 = vadd.f32 %v1133_v53, %v803_v2 }
 0x253   : > { %v874_v0 = vmax.f32 %v871_v63, 0.0 }
 0x255   : > { %1276 = vmatmul.mubr.f32.vlgmr.msra.gmra.mxu1 %v874_v0 }
 0x315   : > { %v958_v8 = vpop.f32.mrf.mxu1 }
 0x316   : > { %v959_v16 = vadd.f32 %v958_v8, %v891_v15 }
 0x317   : > { %v1277_v10 = vpop.f32.mrf.mxu1 }
 0x318   : > { %963 = vst.msk [vmem:[%s311_s15] sm:$0x1] %vm962_vm1, %v959_v16 }
 0x319 PF: > { %p20_p0 = scmp.ge.s32.totalorder %s1522_s12, 4   ;;  %s2034_s26 = smov %s1419_s27 }
 0x31a   : > { %s2035_s27 = smov %s1423_s28  ;;  %s2036_s28 = smov %s1542_s20 }
 0x31b   : > { %s2037_s29 = smov %s1522_s12  ;;  %22 = sbr.rel (!%p20_p0) target bundleno = 7 (0x7), region = 92 }
 0x320   :  { %981 = vsyncpa [#allocation4], 1 }
 0x321   :  { %983 = vsyncpa [#allocation4 + $0x1], 1 }
 0x322   :  { %984 = vsyncpa [#allocation6], 1 }

</bundles_post_ra>
